<compile_context>
chip_gen: v7x
topology: tpu7x:2x2x1
jax: 0.10.0
libtpu: 0.0.40
codegen_flags: <defaults>
</compile_context>

<pallas_src>
import functools

import numpy as np
import jax
import jax.numpy as jnp
from jax.experimental import pallas as pl
from jax.experimental.pallas import tpu as pltpu


# ----------------------------------------------------------------------------
# Tree construction — mirrors HNode.add_child_node / HNet.__init__ exactly.
# ----------------------------------------------------------------------------
class TreeNode:
    def __init__(self, y):
        self.y = list(y)
        self.chn = []
        self.idx = -1  # internal-node index (assigned after the tree is built)

    def add_child(self, y):
        if self.chn:
            ind = [i for i, j in enumerate(self.chn) if set(y).issubset(set(j.y))]
            if ind:
                self.chn[ind[0]].add_child(y)
                return
        self.chn.append(TreeNode(y))


def build_tree(struct):
    struct = [list(s) for s in struct]
    root = TreeNode(struct.pop(0))
    while struct:
        root.add_child(struct.pop(0))
    # BFS-index all internal nodes (nodes that own a classifier).
    internal = []
    queue = [root]
    while queue:
        nd = queue.pop(0)
        if nd.chn:
            nd.idx = len(internal)
            internal.append(nd)
            queue.extend(nd.chn)
    return root, internal


def tree_tables(root, internal, m, c_pad):
    """Static (host-side) tables describing the hierarchy, packed lane layout."""
    # Contiguous lane segment per internal node: node n owns lanes
    # [seg_off[n], seg_off[n] + len(n.chn)).
    seg_off, off = [], 0
    for nd in internal:
        seg_off.append(off)
        off += len(nd.chn)
    c_total = off
    assert c_total <= c_pad, "tree has more total children than C_PAD lanes"

    seg_id = np.full((1, c_pad), -1, np.int32)       # lane -> owning node (-1 = pad)
    child_flat = np.zeros((1, c_pad), np.float32)    # lane -> child idx, or -(label) if leaf
    for n, nd in enumerate(internal):
        for j, c in enumerate(nd.chn):
            lane = seg_off[n] + j
            seg_id[0, lane] = n
            child_flat[0, lane] = float(c.idx) if c.chn else float(-c.y[0])

    def depth(nd):
        return 0 if not nd.chn else 1 + max(depth(c) for c in nd.chn)
    max_depth = depth(root)

    # Training path for each label 1..m: (internal node idx, target lane) per depth.
    path_nodes, target_lane, path_valid = [], [], []
    for lab in range(1, m + 1):
        nd, pn, tl, pv = root, [], [], []
        while nd.chn:
            j = [k for k, c in enumerate(nd.chn) if lab in c.y][0]
            pn.append(nd.idx)
            tl.append(seg_off[nd.idx] + j)
            pv.append(1.0)
            nd = nd.chn[j]
        while len(pn) < max_depth:                   # padded depths contribute 0 loss
            pn.append(0)
            tl.append(0)
            pv.append(0.0)
        path_nodes.append(pn)
        target_lane.append(tl)
        path_valid.append(pv)

    return {
        "seg_off": seg_off,
        "c_total": c_total,
        "max_depth": max_depth,
        "seg_id": jnp.asarray(seg_id),
        "child_flat": jnp.asarray(child_flat),
        "path_nodes": jnp.asarray(np.array(path_nodes, np.int32)),
        "target_lane": jnp.asarray(np.array(target_lane, np.int32)),
        "path_valid": jnp.asarray(np.array(path_valid, np.float32)),
    }


# ----------------------------------------------------------------------------
# Parameters — deterministic synthetic init, packed as one lane-dense slab:
#   w_packed [F_PAD, C_PAD]  (column seg_off[n]+j = node n's Linear weight row j)
#   b_packed [1, C_PAD]
# For large F/N on v6e/v7x, store w (and cast x) as bf16 for the MXU dot while
# keeping softmax math in f32; kept f32 here to match PyTorch f32 numerics.
# ----------------------------------------------------------------------------
def init_params(internal, seg_off, in_features, f_pad, c_pad, key):
    w = np.zeros((f_pad, c_pad), np.float32)
    b = np.zeros((1, c_pad), np.float32)
    for n, nd in enumerate(internal):
        c = len(nd.chn)
        key, k1, k2 = jax.random.split(key, 3)
        w[:in_features, seg_off[n]:seg_off[n] + c] = np.asarray(
            jax.random.normal(k1, (in_features, c)) * 0.1)
        b[0, seg_off[n]:seg_off[n] + c] = np.asarray(
            jax.random.normal(k2, (c,)) * 0.1)
    return jnp.asarray(w), jnp.asarray(b)


def _round_up(n, m):
    return ((n + m - 1) // m) * m


# ----------------------------------------------------------------------------
# Kernel 1: fused logits + greedy argmax tree walk -> predicted label per row.
# (argmax of softmax == argmax of logits, so no softmax needed at inference.)
# ----------------------------------------------------------------------------
def _predict_kernel(max_depth, x_ref, w_ref, b_ref, seg_ref, child_ref, out_ref):
    # One wide MXU matmul over ALL node classifiers at once.
    logits = jnp.dot(x_ref[...], w_ref[...],
                     preferred_element_type=jnp.float32) + b_ref[...]     # [TB, Cp]
    tb, cp = logits.shape
    seg_id = seg_ref[...]                                                 # [1, Cp] int32
    child_f = child_ref[...]                                              # [1, Cp] f32
    lane = jax.lax.broadcasted_iota(jnp.int32, (tb, cp), 1)

    cur = jnp.zeros((tb, 1), jnp.int32)       # current internal node (root = 0)
    done = jnp.zeros((tb, 1), jnp.bool_)
    out = jnp.zeros((tb, 1), jnp.int32)

    for _ in range(max_depth):                # static unrolled, max_depth is tiny
        segm = seg_id == cur                                              # [TB, Cp]
        ml = jnp.where(segm, logits, -1e30)   # off-segment / padded lanes never win
        rowmax = jnp.max(ml, axis=-1, keepdims=True)
        # first lane achieving the max (matches np.argmax tie-breaking)
        best = jnp.min(jnp.where(ml >= rowmax, lane, cp), axis=-1, keepdims=True)
        onehot = (lane == best).astype(jnp.float32)
        nxt = jnp.sum(onehot * child_f, axis=-1, keepdims=True).astype(jnp.int32)
        is_leaf = nxt < 0                     # leaves encoded as -(label)
        out = jnp.where(jnp.logical_and(is_leaf, jnp.logical_not(done)), -nxt, out)
        done = jnp.logical_or(done, is_leaf)
        cur = jnp.where(is_leaf, cur, nxt)

    out_ref[...] = out


def _predict_call(x, w, b, seg_id, child_flat, max_depth, tb):
    bp, fp = x.shape
    cp = w.shape[1]
    grid = (bp // tb,)
    kernel = functools.partial(_predict_kernel, max_depth)
    out = pl.pallas_call(
        kernel,
        out_shape=jax.ShapeDtypeStruct((bp, 1), jnp.int32),
        grid_spec=pltpu.PrefetchScalarGridSpec(
            num_scalar_prefetch=0,
            grid=grid,
            in_specs=[
                pl.BlockSpec((tb, fp), lambda i: (i, 0)),     # x batch tile
                pl.BlockSpec((fp, cp), lambda i: (0, 0)),     # packed W (shared)
                pl.BlockSpec((1, cp), lambda i: (0, 0)),      # packed bias
                pl.BlockSpec((1, cp), lambda i: (0, 0)),      # lane -> node id
                pl.BlockSpec((1, cp), lambda i: (0, 0)),      # lane -> child code
            ],
            out_specs=pl.BlockSpec((tb, 1), lambda i: (i, 0)),
        ),
        compiler_params=pltpu.CompilerParams(
            dimension_semantics=("parallel",),                # batch axis -> megacore
            vmem_limit_bytes=32 * 1024 * 1024,
        ),
    )(x, w, b, seg_id, child_flat)
    return out[:, 0]


# ----------------------------------------------------------------------------
# Kernel 2: fused logits + per-depth segmented softmax + path BCE loss per row.
# ----------------------------------------------------------------------------
def _train_kernel(max_depth, x_ref, w_ref, b_ref, seg_ref, pn_ref, tl_ref, pv_ref,
                  loss_ref):
    logits = jnp.dot(x_ref[...], w_ref[...],
                     preferred_element_type=jnp.float32) + b_ref[...]     # [TB, Cp]
    tb, cp = logits.shape
    seg_id = seg_ref[...]                                                 # [1, Cp]
    lane = jax.lax.broadcasted_iota(jnp.int32, (tb, cp), 1)
    losses = jnp.zeros((tb, 1), jnp.float32)

    for d in range(max_depth):                # static unrolled (small tree depth)
        node = pn_ref[:, d:d + 1]             # [TB,1] node on the label's path
        tgt = tl_ref[:, d:d + 1]              # [TB,1] target lane (correct child)
        valid = pv_ref[:, d:d + 1]            # [TB,1] 1.0 for real depths, else 0.0

        segm = seg_id == node                                             # [TB, Cp]
        ml = jnp.where(segm, logits, -1e30)
        m = jnp.max(ml, axis=-1, keepdims=True)                           # segment max
        e = jnp.exp(ml - m)                   # off-segment lanes underflow to exactly 0
        denom = jnp.sum(e, axis=-1, keepdims=True)                        # >= 1
        p = e * pl.reciprocal(denom, approx=True)
        p = jnp.clip(p, 0.0, 1.0)

        t = (lane == tgt).astype(jnp.float32)                             # one-hot target
        log_p = jnp.maximum(jnp.log(p), -100.0)        # PyTorch BCELoss log clamp
        log_1mp = jnp.maximum(jnp.log(1.0 - p), -100.0)
        elem = -(t * log_p + (1.0 - t) * log_1mp)
        segf = segm.astype(jnp.float32)
        elem = elem * segf                                                # segment lanes only
        count = jnp.sum(segf, axis=-1, keepdims=True)                     # = n children
        bce = jnp.sum(elem, axis=-1, keepdims=True) / count               # mean over children
        losses = losses + valid * bce

    loss_ref[...] = losses


def _train_call(x, w, b, seg_id, pn, tl, pv, max_depth, tb):
    bp, fp = x.shape
    cp = w.shape[1]
    grid = (bp // tb,)
    kernel = functools.partial(_train_kernel, max_depth)
    out = pl.pallas_call(
        kernel,
        out_shape=jax.ShapeDtypeStruct((bp, 1), jnp.float32),
        grid_spec=pltpu.PrefetchScalarGridSpec(
            num_scalar_prefetch=0,
            grid=grid,
            in_specs=[
                pl.BlockSpec((tb, fp), lambda i: (i, 0)),
                pl.BlockSpec((fp, cp), lambda i: (0, 0)),
                pl.BlockSpec((1, cp), lambda i: (0, 0)),
                pl.BlockSpec((1, cp), lambda i: (0, 0)),
                pl.BlockSpec((tb, max_depth), lambda i: (i, 0)),
                pl.BlockSpec((tb, max_depth), lambda i: (i, 0)),
                pl.BlockSpec((tb, max_depth), lambda i: (i, 0)),
            ],
            out_specs=pl.BlockSpec((tb, 1), lambda i: (i, 0)),
        ),
        compiler_params=pltpu.CompilerParams(
            dimension_semantics=("parallel",),
            vmem_limit_bytes=32 * 1024 * 1024,
        ),
    )(x, w, b, seg_id, pn, tl, pv)
    return out[:, 0]


# ----------------------------------------------------------------------------
# HNet.forward
#   train=False -> greedy argmax traversal, returns leaf label per sample (_argmax)
#   train=True  -> sum of per-node BCE losses along the label's path     (_train)
# ----------------------------------------------------------------------------
def hnet_forward(x, w, b, tables, labels=None, train=False):
    # TODO(synk): nn.Dropout(p=0.25) inside each node classifier is treated as
    # identity (eval-mode semantics); train-mode stochastic dropout not modeled.
    bsz, f = x.shape
    fp, _ = w.shape
    if f < fp:                                        # zero-pad features (identity for dot)
        x = jnp.pad(x, ((0, 0), (0, fp - f)))
    tb = min(128, _round_up(bsz, 8))                  # batch tile (sublane-aligned)
    bp = _round_up(bsz, tb)
    if bp > bsz:
        x = jnp.pad(x, ((0, bp - bsz), (0, 0)))
    max_depth = tables["max_depth"]

    if not train:
        preds = _predict_call(x, w, b, tables["seg_id"], tables["child_flat"],
                              max_depth, tb)
        return preds[:bsz]

    # Gather the static per-label path tables (tiny, plain JAX).
    pn = tables["path_nodes"][labels - 1]             # [B, max_depth]
    tl = tables["target_lane"][labels - 1]
    pv = tables["path_valid"][labels - 1]
    if bp > bsz:
        pad = ((0, bp - bsz), (0, 0))
        pn = jnp.pad(pn, pad)
        tl = jnp.pad(tl, pad)
        pv = jnp.pad(pv, pad)                         # padded rows: valid=0 -> zero loss
    losses = _train_call(x, w, b, tables["seg_id"], pn, tl, pv, max_depth, tb)
    return losses[:bsz]


# ----------------------------------------------------------------------------
# Pure NumPy reference (mirrors HNet._argmax / HNet._train) for validation.
# ----------------------------------------------------------------------------
def reference_forward(x, w, b, tables, labels=None, train=False):
    xn = np.asarray(x, np.float32)
    wn = np.asarray(w, np.float32)
    bn = np.asarray(b, np.float32)
    f, fp = xn.shape[1], wn.shape[0]
    xp = np.pad(xn, ((0, 0), (0, fp - f)))
    logits = xp @ wn + bn
    seg_id = np.asarray(tables["seg_id"])[0]
    child = np.asarray(tables["child_flat"])[0]
    max_depth = tables["max_depth"]
    bsz = xn.shape[0]

    if not train:
        out = np.zeros((bsz,), np.int32)
        for bi in range(bsz):
            cur = 0
            for _ in range(max_depth):
                lanes = np.where(seg_id == cur)[0]
                best = lanes[int(np.argmax(logits[bi, lanes]))]
                nxt = int(child[best])
                if nxt < 0:
                    out[bi] = -nxt
                    break
                cur = nxt
        return out

    pn = np.asarray(tables["path_nodes"])[np.asarray(labels) - 1]
    tl = np.asarray(tables["target_lane"])[np.asarray(labels) - 1]
    pv = np.asarray(tables["path_valid"])[np.asarray(labels) - 1]
    losses = np.zeros((bsz,), np.float32)
    for bi in range(bsz):
        for d in range(max_depth):
            if pv[bi, d] == 0:
                continue
            n = pn[bi, d]
            lanes = np.where(seg_id == n)[0]
            l = logits[bi, lanes]
            e = np.exp(l - l.max())
            p = e / e.sum()
            t = (lanes == tl[bi, d]).astype(np.float32)
            with np.errstate(divide="ignore"):
                lp = np.maximum(np.log(np.clip(p, 0.0, 1.0)), -100.0)
                l1p = np.maximum(np.log(np.clip(1.0 - p, 0.0, 1.0)), -100.0)
            elem = -(t * lp + (1.0 - t) * l1p)
            losses[bi] += elem.mean()
    return losses


# ----------------------------------------------------------------------------
if __name__ == "__main__":
    B, F, M = 8, 32, 8
    C_PAD = 128           # total children across the tree (14) packed into one tile
    F_PAD = 128           # features zero-padded to a lane-friendly contraction size
    # hierarchy: binary tree over labels 1..8 (root first, as HNet expects)
    struct = [
        [1, 2, 3, 4, 5, 6, 7, 8],
        [1, 2, 3, 4], [1, 2], [1], [2], [3, 4], [3], [4],
        [5, 6, 7, 8], [5, 6], [5], [6], [7, 8], [7], [8],
    ]

    root, internal = build_tree(struct)
    tables = tree_tables(root, internal, M, C_PAD)

    key = jax.random.PRNGKey(0)
    kx, kl, kp = jax.random.split(key, 3)
    x = jax.random.normal(kx, (B, F), dtype=jnp.float32)
    labels = jax.random.randint(kl, (B,), 1, M + 1)
    w, b = init_params(internal, tables["seg_off"], F, F_PAD, C_PAD, kp)

    preds = hnet_forward(x, w, b, tables, train=False)                       # forward(x, train=False)
    losses = hnet_forward(x, w, b, tables, labels=labels, train=True)        # forward(x, l, train=True)
    jax.block_until_ready((preds, losses))

    assert preds.shape == (B,) and losses.shape == (B,)
    assert bool(jnp.all((preds >= 1) & (preds <= M)))
    assert bool(jnp.all(jnp.isfinite(losses)))

    # Validate against the plain reference implementation.
    ref_preds = reference_forward(x, w, b, tables, train=False)
    ref_losses = reference_forward(x, w, b, tables, labels=labels, train=True)
    assert np.array_equal(np.asarray(preds), ref_preds), (preds, ref_preds)
    np.testing.assert_allclose(np.asarray(losses), ref_losses, rtol=5e-2, atol=1e-3)

    print("KERNEL_OK")
</pallas_src>

<mosaic_0001>
module attributes {stable_mosaic.version = 11 : i64} {
  func.func @_predict_kernel(%arg0: i32, %arg1: memref<8x128xf32, #tpu.memory_space<vmem>>, %arg2: memref<128x128xf32, #tpu.memory_space<vmem>>, %arg3: memref<1x128xf32, #tpu.memory_space<vmem>>, %arg4: memref<1x128xi32, #tpu.memory_space<vmem>>, %arg5: memref<1x128xf32, #tpu.memory_space<vmem>>, %arg6: memref<8x1xi32, #tpu.memory_space<vmem>>) attributes {dimension_semantics = [#tpu.dimension_semantics<parallel>], iteration_bounds = array<i64: 1>, scalar_prefetch = 0 : i64, scratch_operands = 0 : i64, tpu.core_type = #tpu.core_type<tc>, window_params = [{transform_indices = @transform_0, window_bounds = array<i64: 8, 128>}, {pipeline_mode = #tpu.pipeline_mode<synchronous>, transform_indices = @transform_1, window_bounds = array<i64: 128, 128>}, {pipeline_mode = #tpu.pipeline_mode<synchronous>, transform_indices = @transform_2, window_bounds = array<i64: 1, 128>}, {pipeline_mode = #tpu.pipeline_mode<synchronous>, transform_indices = @transform_3, window_bounds = array<i64: 1, 128>}, {pipeline_mode = #tpu.pipeline_mode<synchronous>, transform_indices = @transform_4, window_bounds = array<i64: 1, 128>}, {transform_indices = @transform_5, window_bounds = array<i64: 8, 1>}]} {
    %c0 = arith.constant 0 : index
    %c0_0 = arith.constant 0 : index
    %0 = vector.load %arg1[%c0, %c0_0] : memref<8x128xf32, #tpu.memory_space<vmem>>, vector<8x128xf32>
    %c0_1 = arith.constant 0 : index
    %c0_2 = arith.constant 0 : index
    %1 = vector.load %arg2[%c0_1, %c0_2] : memref<128x128xf32, #tpu.memory_space<vmem>>, vector<128x128xf32>
    %cst = arith.constant dense<0.000000e+00> : vector<8x128xf32>
    %2 = tpu.matmul %0, %1, %cst {dimension_numbers = #tpu.dot_dimension_numbers<[1], [0], [0], [1], [0, 0, 1, 1], [], []>} : vector<8x128xf32>, vector<128x128xf32>, vector<8x128xf32> -> vector<8x128xf32>
    %c0_3 = arith.constant 0 : index
    %c0_4 = arith.constant 0 : index
    %3 = vector.load %arg3[%c0_3, %c0_4] : memref<1x128xf32, #tpu.memory_space<vmem>>, vector<1x128xf32>
    %4 = vector.broadcast %3 : vector<1x128xf32> to vector<8x128xf32>
    %5 = arith.addf %2, %4 : vector<8x128xf32>
    %c0_5 = arith.constant 0 : index
    %c0_6 = arith.constant 0 : index
    %6 = vector.load %arg4[%c0_5, %c0_6] : memref<1x128xi32, #tpu.memory_space<vmem>>, vector<1x128xi32>
    %c0_7 = arith.constant 0 : index
    %c0_8 = arith.constant 0 : index
    %7 = vector.load %arg5[%c0_7, %c0_8] : memref<1x128xf32, #tpu.memory_space<vmem>>, vector<1x128xf32>
    %8 = tpu.iota {dimensions = array<i32: 1>} : vector<8x128xi32>
    %c0_i32 = arith.constant 0 : i32
    %9 = vector.broadcast %c0_i32 : i32 to vector<8x1xi32>
    %false = arith.constant false
    %10 = vector.broadcast %false : i1 to vector<8x1xi1>
    %c0_i32_9 = arith.constant 0 : i32
    %11 = vector.broadcast %c0_i32_9 : i32 to vector<8x1xi32>
    %12 = vector.broadcast %6 : vector<1x128xi32> to vector<8x128xi32>
    %13 = vector.broadcast %9 : vector<8x1xi32> to vector<8x128xi32>
    %14 = arith.cmpi eq, %12, %13 : vector<8x128xi32>
    %cst_10 = arith.constant -1.000000e+30 : f32
    %15 = vector.broadcast %cst_10 : f32 to vector<8x128xf32>
    %16 = arith.select %14, %5, %15 : vector<8x128xi1>, vector<8x128xf32>
    %cst_11 = arith.constant dense<0xFF800000> : vector<8xf32>
    %17 = vector.multi_reduction <maximumf>, %16, %cst_11 [1] : vector<8x128xf32> to vector<8xf32>
    %18 = vector.shape_cast %17 : vector<8xf32> to vector<8x1xf32>
    %19 = vector.broadcast %18 : vector<8x1xf32> to vector<8x128xf32>
    %20 = arith.cmpf oge, %16, %19 : vector<8x128xf32>
    %c128_i32 = arith.constant 128 : i32
    %21 = vector.broadcast %c128_i32 : i32 to vector<8x128xi32>
    %22 = arith.select %20, %8, %21 : vector<8x128xi1>, vector<8x128xi32>
    %cst_12 = arith.constant dense<2147483647> : vector<8xi32>
    %23 = vector.multi_reduction <minsi>, %22, %cst_12 [1] : vector<8x128xi32> to vector<8xi32>
    %24 = vector.shape_cast %23 : vector<8xi32> to vector<8x1xi32>
    %25 = vector.broadcast %24 : vector<8x1xi32> to vector<8x128xi32>
    %26 = arith.cmpi eq, %8, %25 : vector<8x128xi32>
    %27 = arith.extui %26 : vector<8x128xi1> to vector<8x128xi32>
    %28 = arith.sitofp %27 : vector<8x128xi32> to vector<8x128xf32>
    %29 = vector.broadcast %7 : vector<1x128xf32> to vector<8x128xf32>
    %30 = arith.mulf %28, %29 : vector<8x128xf32>
    %cst_13 = arith.constant dense<0.000000e+00> : vector<8xf32>
    %31 = vector.multi_reduction <add>, %30, %cst_13 [1] : vector<8x128xf32> to vector<8xf32>
    %32 = vector.shape_cast %31 : vector<8xf32> to vector<8x1xf32>
    %33 = arith.fptosi %32 : vector<8x1xf32> to vector<8x1xi32>
    %c0_i32_14 = arith.constant 0 : i32
    %34 = vector.broadcast %c0_i32_14 : i32 to vector<8x1xi32>
    %35 = arith.cmpi slt, %33, %34 : vector<8x1xi32>
    %cst_15 = arith.constant dense<true> : vector<8x1xi1>
    %36 = arith.xori %10, %cst_15 : vector<8x1xi1>
    %37 = arith.andi %35, %36 : vector<8x1xi1>
    %c0_i32_16 = arith.constant 0 : i32
    %38 = vector.broadcast %c0_i32_16 : i32 to vector<8x1xi32>
    %39 = arith.subi %38, %33 : vector<8x1xi32>
    %40 = arith.select %37, %39, %11 : vector<8x1xi1>, vector<8x1xi32>
    %41 = arith.ori %10, %35 : vector<8x1xi1>
    %42 = arith.select %35, %9, %33 : vector<8x1xi1>, vector<8x1xi32>
    %43 = vector.broadcast %6 : vector<1x128xi32> to vector<8x128xi32>
    %44 = vector.broadcast %42 : vector<8x1xi32> to vector<8x128xi32>
    %45 = arith.cmpi eq, %43, %44 : vector<8x128xi32>
    %cst_17 = arith.constant -1.000000e+30 : f32
    %46 = vector.broadcast %cst_17 : f32 to vector<8x128xf32>
    %47 = arith.select %45, %5, %46 : vector<8x128xi1>, vector<8x128xf32>
    %cst_18 = arith.constant dense<0xFF800000> : vector<8xf32>
    %48 = vector.multi_reduction <maximumf>, %47, %cst_18 [1] : vector<8x128xf32> to vector<8xf32>
    %49 = vector.shape_cast %48 : vector<8xf32> to vector<8x1xf32>
    %50 = vector.broadcast %49 : vector<8x1xf32> to vector<8x128xf32>
    %51 = arith.cmpf oge, %47, %50 : vector<8x128xf32>
    %c128_i32_19 = arith.constant 128 : i32
    %52 = vector.broadcast %c128_i32_19 : i32 to vector<8x128xi32>
    %53 = arith.select %51, %8, %52 : vector<8x128xi1>, vector<8x128xi32>
    %cst_20 = arith.constant dense<2147483647> : vector<8xi32>
    %54 = vector.multi_reduction <minsi>, %53, %cst_20 [1] : vector<8x128xi32> to vector<8xi32>
    %55 = vector.shape_cast %54 : vector<8xi32> to vector<8x1xi32>
    %56 = vector.broadcast %55 : vector<8x1xi32> to vector<8x128xi32>
    %57 = arith.cmpi eq, %8, %56 : vector<8x128xi32>
    %58 = arith.extui %57 : vector<8x128xi1> to vector<8x128xi32>
    %59 = arith.sitofp %58 : vector<8x128xi32> to vector<8x128xf32>
    %60 = vector.broadcast %7 : vector<1x128xf32> to vector<8x128xf32>
    %61 = arith.mulf %59, %60 : vector<8x128xf32>
    %cst_21 = arith.constant dense<0.000000e+00> : vector<8xf32>
    %62 = vector.multi_reduction <add>, %61, %cst_21 [1] : vector<8x128xf32> to vector<8xf32>
    %63 = vector.shape_cast %62 : vector<8xf32> to vector<8x1xf32>
    %64 = arith.fptosi %63 : vector<8x1xf32> to vector<8x1xi32>
    %c0_i32_22 = arith.constant 0 : i32
    %65 = vector.broadcast %c0_i32_22 : i32 to vector<8x1xi32>
    %66 = arith.cmpi slt, %64, %65 : vector<8x1xi32>
    %cst_23 = arith.constant dense<true> : vector<8x1xi1>
    %67 = arith.xori %41, %cst_23 : vector<8x1xi1>
    %68 = arith.andi %66, %67 : vector<8x1xi1>
    %c0_i32_24 = arith.constant 0 : i32
    %69 = vector.broadcast %c0_i32_24 : i32 to vector<8x1xi32>
    %70 = arith.subi %69, %64 : vector<8x1xi32>
    %71 = arith.select %68, %70, %40 : vector<8x1xi1>, vector<8x1xi32>
    %72 = arith.ori %41, %66 : vector<8x1xi1>
    %73 = arith.select %66, %42, %64 : vector<8x1xi1>, vector<8x1xi32>
    %74 = vector.broadcast %6 : vector<1x128xi32> to vector<8x128xi32>
    %75 = vector.broadcast %73 : vector<8x1xi32> to vector<8x128xi32>
    %76 = arith.cmpi eq, %74, %75 : vector<8x128xi32>
    %cst_25 = arith.constant -1.000000e+30 : f32
    %77 = vector.broadcast %cst_25 : f32 to vector<8x128xf32>
    %78 = arith.select %76, %5, %77 : vector<8x128xi1>, vector<8x128xf32>
    %cst_26 = arith.constant dense<0xFF800000> : vector<8xf32>
    %79 = vector.multi_reduction <maximumf>, %78, %cst_26 [1] : vector<8x128xf32> to vector<8xf32>
    %80 = vector.shape_cast %79 : vector<8xf32> to vector<8x1xf32>
    %81 = vector.broadcast %80 : vector<8x1xf32> to vector<8x128xf32>
    %82 = arith.cmpf oge, %78, %81 : vector<8x128xf32>
    %c128_i32_27 = arith.constant 128 : i32
    %83 = vector.broadcast %c128_i32_27 : i32 to vector<8x128xi32>
    %84 = arith.select %82, %8, %83 : vector<8x128xi1>, vector<8x128xi32>
    %cst_28 = arith.constant dense<2147483647> : vector<8xi32>
    %85 = vector.multi_reduction <minsi>, %84, %cst_28 [1] : vector<8x128xi32> to vector<8xi32>
    %86 = vector.shape_cast %85 : vector<8xi32> to vector<8x1xi32>
    %87 = vector.broadcast %86 : vector<8x1xi32> to vector<8x128xi32>
    %88 = arith.cmpi eq, %8, %87 : vector<8x128xi32>
    %89 = arith.extui %88 : vector<8x128xi1> to vector<8x128xi32>
    %90 = arith.sitofp %89 : vector<8x128xi32> to vector<8x128xf32>
    %91 = vector.broadcast %7 : vector<1x128xf32> to vector<8x128xf32>
    %92 = arith.mulf %90, %91 : vector<8x128xf32>
    %cst_29 = arith.constant dense<0.000000e+00> : vector<8xf32>
    %93 = vector.multi_reduction <add>, %92, %cst_29 [1] : vector<8x128xf32> to vector<8xf32>
    %94 = vector.shape_cast %93 : vector<8xf32> to vector<8x1xf32>
    %95 = arith.fptosi %94 : vector<8x1xf32> to vector<8x1xi32>
    %c0_i32_30 = arith.constant 0 : i32
    %96 = vector.broadcast %c0_i32_30 : i32 to vector<8x1xi32>
    %97 = arith.cmpi slt, %95, %96 : vector<8x1xi32>
    %cst_31 = arith.constant dense<true> : vector<8x1xi1>
    %98 = arith.xori %72, %cst_31 : vector<8x1xi1>
    %99 = arith.andi %97, %98 : vector<8x1xi1>
    %c0_i32_32 = arith.constant 0 : i32
    %100 = vector.broadcast %c0_i32_32 : i32 to vector<8x1xi32>
    %101 = arith.subi %100, %95 : vector<8x1xi32>
    %102 = arith.select %99, %101, %71 : vector<8x1xi1>, vector<8x1xi32>
    %c0_33 = arith.constant 0 : index
    %c0_34 = arith.constant 0 : index
    %103 = vector.load %arg6[%c0_33, %c0_34] : memref<8x1xi32, #tpu.memory_space<vmem>>, vector<8x1xi32>
    tpu.vector_store %arg6[%c0_33, %c0_34], %102 {strides = array<i32>} : memref<8x1xi32, #tpu.memory_space<vmem>>, vector<8x1xi32>,
    return
  }
  func.func @transform_0(%arg0: i32) -> (i32, i32) {
    %c0_i32 = arith.constant 0 : i32
    %c0_i32_0 = arith.constant 0 : i32
    return %arg0, %c0_i32 : i32, i32
  }
  func.func @transform_1(%arg0: i32) -> (i32, i32) {
    %c0_i32 = arith.constant 0 : i32
    %c0_i32_0 = arith.constant 0 : i32
    %c0_i32_1 = arith.constant 0 : i32
    return %c0_i32, %c0_i32_0 : i32, i32
  }
  func.func @transform_2(%arg0: i32) -> (i32, i32) {
    %c0_i32 = arith.constant 0 : i32
    %c0_i32_0 = arith.constant 0 : i32
    %c0_i32_1 = arith.constant 0 : i32
    return %c0_i32, %c0_i32_0 : i32, i32
  }
  func.func @transform_3(%arg0: i32) -> (i32, i32) {
    %c0_i32 = arith.constant 0 : i32
    %c0_i32_0 = arith.constant 0 : i32
    %c0_i32_1 = arith.constant 0 : i32
    return %c0_i32, %c0_i32_0 : i32, i32
  }
  func.func @transform_4(%arg0: i32) -> (i32, i32) {
    %c0_i32 = arith.constant 0 : i32
    %c0_i32_0 = arith.constant 0 : i32
    %c0_i32_1 = arith.constant 0 : i32
    return %c0_i32, %c0_i32_0 : i32, i32
  }
  func.func @transform_5(%arg0: i32) -> (i32, i32) {
    %c0_i32 = arith.constant 0 : i32
    %c0_i32_0 = arith.constant 0 : i32
    return %arg0, %c0_i32 : i32, i32
  }
}

</mosaic_0001>

<bundles_post_ra>
// kernel: tpu_custom_call.1
= control target key start
LH: loop header
LB: loop body
LE: loop exit
PB: predicated region body
PF: predicated region fallthrough
CT: control target
= control target key end

     0   :  { %10 = vsyncpa [#allocation3], 0  ;;  %s529_s0 = inlined_call_operand.hbm [shape: f32[8,128], index: 0, kind: input, shape index: {}]   ;;  %s530_s1 = inlined_call_operand.hbm [shape: f32[128,128], index: 1, kind: input, shape index: {}]   ;;  %s531_s2 = inlined_call_operand.vmem [shape: f32[1,128], index: 2, kind: input, shape index: {}]   ;;  %s532_s3 = inlined_call_operand.vmem [shape: s32[1,128], index: 3, kind: input, shape index: {}]   ;;  %s533_s4 = inlined_call_operand.vmem [shape: f32[1,128], index: 4, kind: input, shape index: {}]   ;;  %s534_s5 = inlined_call_operand.vmem [shape: s32[8,1], index: 5, kind: output, shape index: {}]  }
   0x1   :  { %11 = vsyncpa [#allocation5], 0  ;;  %s403_s18 = smov [#allocation2]   ;;  %s404_s20 = smov [#allocation4]  }
   0x2   :  { %s18_s19 = sshll.u32 %s403_s18, 4  ;;  %s27_s21 = sshll.u32 %s404_s20, 4  ;;  %s19_s19 = int_to_ptr.vmem [resolvable:$true] %s18_s19  ;;  %s441_s21 = int_to_ptr.vmem [resolvable:$true] %s27_s21 }
   0x3   :  { %s355_s24 = scalar_lea.hbm %s529_s0, 128 }
   0x4   :  { %p356_p0 = scmp.ne.s32.totalorder %s529_s0, %s355_s24  ;;  %p359_p1 = scmp.lt.u32.totalorder %s355_s24, %s529_s0 }
   0x6   :  { %p361_p2 = pnand %p359_p1, %p356_p0 }
   0x8   :  { %364 = shalt.err (!%p361_p2)
}
   0x9   :  { %s365_s29 = scalar_lea.vmem %s19_s19, 128  ;;  %p370_p4 = scmp.lt.s32.totalorder %s19_s19, %s19_s19 }
   0xa   :  { %p366_p3 = scmp.ne.s32.totalorder %s19_s19, %s365_s29  ;;  %p371_p5 = scmp.lt.s32.totalorder %s365_s29, %s365_s29 }
   0xc   :  { %p372_p6 = por %p371_p5, %p370_p4 }
   0xe   :  { %p373_p7 = pnand %p372_p6, %p366_p3 }
  0x10   :  { %376 = shalt.err (!%p373_p7)
}
  0x11   :  { %21 = dma.hbm_to_vmem [thread:$0]  %s529_s0, 128, %s19_s19, [#allocation3]  }
  0x12   :  { %s377_s9 = scalar_lea.hbm %s530_s1, 2048 }
  0x13   :  { %p378_p8 = scmp.ne.s32.totalorder %s530_s1, %s377_s9  ;;  %p381_p9 = scmp.lt.u32.totalorder %s377_s9, %s530_s1 }
  0x15   :  { %p383_p10 = pnand %p381_p9, %p378_p8 }
  0x17   :  { %386 = shalt.err (!%p383_p10)
}
  0x18   :  { %s387_s14 = scalar_lea.vmem %s441_s21, 2048  ;;  %p392_p12 = scmp.lt.s32.totalorder %s441_s21, %s441_s21 }
  0x19   :  { %p388_p11 = scmp.ne.s32.totalorder %s441_s21, %s387_s14  ;;  %p393_p13 = scmp.lt.s32.totalorder %s387_s14, %s387_s14 }
  0x1b   :  { %p394_p0 = por %p393_p13, %p392_p12 }
  0x1d   :  { %p395_p1 = pnand %p394_p0, %p388_p11 }
  0x1f   :  { %398 = shalt.err (!%p395_p1)
}
  0x20   :  { %s405_s0 = smov 128   ;;  %s406_s15 = smov 8  }
  0x21   :  { %33 = dma.hbm_to_vmem [thread:$0]  %s530_s1, 2048, %s441_s21, [#allocation5], %s405_s0, %s405_s0, %s406_s15  }
  0x22   :  { %399 = dma.done.wait [#allocation3], 128  }
  0x23   :  { %400 = vsyncadd [#allocation3], 4294967168 }
  0x24   :  { %401 = dma.done.wait [#allocation5], 2048  }
  0x25   :  { %402 = vsyncadd [#allocation5], 4294965248  ;;  %v407_v0 = vmov 0.0|0.0   ;;  %vm408_vm0 = vmmov 0   ;;  %v409_v1 = vmov 0.0   ;;  %v47_v2 = vld [vmem:[#allocation4] sm:$0xff]  ;;  %v142_v33 = vlaneseq }
  0x26   :  { %317 = vmatprep.subr.bf16.mxu0 %v407_v0  ;;  %314 = vmatprep.mubr.msk.f32.mxu0 %vm408_vm0, %v409_v1  ;;  %v48_v3 = vld [vmem:[#allocation4 + $0x8] sm:$0xff]  ;;  %v49_v4 = vld [vmem:[#allocation4 + $0x10] sm:$0xff]  ;;  %v50_v6 = vld [vmem:[#allocation4 + $0x18] sm:$0xff]  ;;  %vm410_vm11 = vmmov 1  }
  0x27   :  { %v318_v5 = vpack.c.bf16 %v48_v3, %v47_v2  ;;  %v321_v7 = vpack.c.bf16 %v50_v6, %v49_v4  ;;  %v51_v8 = vld [vmem:[#allocation4 + $0x20] sm:$0xff]  ;;  %v52_v9 = vld [vmem:[#allocation4 + $0x28] sm:$0xff]  ;;  %v53_v11 = vld [vmem:[#allocation4 + $0x30] sm:$0xff]  ;;  %v485_v34 = vand.u32 127, %v142_v33 }
  0x28   :  { %v324_v10 = vpack.c.bf16 %v52_v9, %v51_v8  ;;  %v54_v12 = vld [vmem:[#allocation4 + $0x38] sm:$0xff]  ;;  %v55_v14 = vld [vmem:[#allocation4 + $0x40] sm:$0xff]  ;;  %v56_v15 = vld [vmem:[#allocation4 + $0x48] sm:$0xff] }
  0x29   :  { %319 = vmatpush3.bf16.msra.mxu0 %v318_v5  ;;  %v327_v13 = vpack.c.bf16 %v54_v12, %v53_v11  ;;  %v330_v16 = vpack.c.bf16 %v56_v15, %v55_v14  ;;  %v57_v17 = vld [vmem:[#allocation4 + $0x50] sm:$0xff]  ;;  %v58_v18 = vld [vmem:[#allocation4 + $0x58] sm:$0xff]  ;;  %v59_v20 = vld [vmem:[#allocation4 + $0x60] sm:$0xff] }
  0x2a   :  { %320 = vmatprep.subr.bf16.mxu0 %v407_v0  ;;  %v333_v19 = vpack.c.bf16 %v58_v18, %v57_v17  ;;  %v60_v21 = vld [vmem:[#allocation4 + $0x68] sm:$0xff]  ;;  %v61_v23 = vld [vmem:[#allocation4 + $0x70] sm:$0xff]  ;;  %v62_v24 = vld [vmem:[#allocation4 + $0x78] sm:$0xff] }
  0x2b   :  { %v336_v22 = vpack.c.bf16 %v60_v21, %v59_v20  ;;  %v339_v25 = vpack.c.bf16 %v62_v24, %v61_v23  ;;  %v46_v26 = vld [vmem:[#allocation2] sm:$0xff] }
  0x2c   :  { %v476_v27 = vld [vmem:[%s532_s3] ss:$0 sm:$0xff] }
  0x2d   :  { %322 = vmatpush3.bf16.msra.mxu0 %v321_v7  ;;  %v259_v28 = vld [vmem:[%s531_s2] ss:$0 sm:$0xff]  ;;  %vm148_vm1 = vcmp.eq.s32.totalorder %v476_v27, 0 }
  0x2e   :  { %323 = vmatprep.subr.bf16.mxu0 %v407_v0  ;;  %v491_v48 = vld [vmem:[%s533_s4] ss:$0 sm:$0xff] }
  0x31   :  { %325 = vmatpush3.bf16.msra.mxu0 %v324_v10 }
  0x32   :  { %326 = vmatprep.subr.bf16.mxu0 %v407_v0 }
  0x35   :  { %328 = vmatpush3.bf16.msra.mxu0 %v327_v13 }
  0x36   :  { %329 = vmatprep.subr.bf16.mxu0 %v407_v0 }
  0x39   :  { %331 = vmatpush3.bf16.msra.mxu0 %v330_v16 }
  0x3a   :  { %332 = vmatprep.subr.bf16.mxu0 %v407_v0 }
  0x3d   :  { %334 = vmatpush3.bf16.msra.mxu0 %v333_v19 }
  0x3e   :  { %335 = vmatprep.subr.bf16.mxu0 %v407_v0 }
  0x41   :  { %337 = vmatpush3.bf16.msra.mxu0 %v336_v22 }
  0x42   :  { %338 = vmatprep.subr.bf16.mxu0 %v407_v0 }
  0x45   :  { %340 = vmatpush3.bf16.msra.mxu0 %v339_v25 }
  0x48   :  { %315 = vmatmul.mubr.f32.vlgmr.msra.gmra.mrb[0].mxu0 %v46_v26 }
 0x11b   :  { %v136_v29 = vpop.f32.mrb[0].mxu0 }
 0x11c   :  { %v482_v30 = vadd.f32 %v259_v28, %v136_v29  ;;  %v316_v31 = vpop.f32.mrb[1].mxu0 }
 0x11e   :  { %v149_v32 = vsel %vm148_vm1, %v482_v30, -1e+30 }
 0x11f   :  { %150 = vmax.xlane.f32.xlu0 %v149_v32 }
 0x1ac   :  { %v151_v35 = vpop.xlane.xlu0 %150 }
 0x1ad   :  { %vm152_vm2 = vcmp.ge.f32.partialorder %v149_v32, %v151_v35 }
 0x1ae   :  { %v153_v36 = vsel %vm152_vm2, %v485_v34, 128 }
 0x1af   :  { %v155_v37 = vshra.s32 %v153_v36, 16  ;;  %v154_v39 = vand.u32 65535, %v153_v36 }
 0x1b1   :  { %v157_v38 = vcvt.s32.f32 %v155_v37  ;;  %v156_v41 = vcvt.s32.f32 %v154_v39 }
 0x1b3   :  { %158 = vmin.xlane.f32.xlu0 %v157_v38 }
 0x240   :  { %v159_v40 = vpop.xlane.xlu0 %158 }
 0x241   :  { %vm160_vm3 = vcmp.eq.f32.partialorder %v157_v38, %v159_v40  ;;  %v165_v43 = vcvt.f32.s32 %v159_v40 }
 0x242   :  { %v161_v42 = vsel %vm160_vm3, %v156_v41, inf  ;;  %vm251_vm3 = vcmask 7168  }
 0x243   :  { %162 = vmin.xlane.f32.xlu1 %v161_v42  ;;  %v166_v45 = vshll.u32 %v165_v43, 16 }
 0x2d0   :  { %v163_v44 = vpop.xlane.xlu1 %162 }
 0x2d1   :  { %v164_v46 = vcvt.f32.s32 %v163_v44 }
 0x2d3   :  { %v167_v47 = vadd.s32 %v166_v45, %v164_v46 }
 0x2d5   :  { %vm168_vm4 = vcmp.eq.s32.totalorder %v485_v34, %v167_v47 }
 0x2d6   :  { %v261_v49 = vsel %vm168_vm4, 1.0, %v409_v1 }
 0x2d7   :  { %v177_v50 = vmul.f32 %v491_v48, %v261_v49 }
 0x2d9   :  { %178 = vadd.xlane.f32.xlu1 %v177_v50 }
 0x366   :  { %v179_v51 = vpop.xlane.xlu1 %178 }
 0x367   :  { %v341_v52 = vtrunc.f32 %v179_v51 }
 0x369   :  { %v496_v53 = vcvt.f32.s32 %v341_v52 }
 0x36b   :  { %vm181_vm5 = vcmp.lt.s32.totalorder %v496_v53, 0  ;;  %v182_v10 = vsub.s32 0, %v496_v53 }
 0x36c   :  { %v184_v54 = vsel %vm181_vm5, 0, %v496_v53  ;;  %vm213_vm12 = vmxor %vm181_vm5, %vm410_vm11 }
 0x36d   :  { %vm185_vm6 = vcmp.eq.s32.totalorder %v476_v27, %v184_v54  ;;  %v183_v13 = vsel %vm181_vm5, %v182_v10, 0 }
 0x36e   :  { %v186_v55 = vsel %vm185_vm6, %v482_v30, -1e+30 }
 0x36f   :  { %187 = vmax.xlane.f32.xlu0 %v186_v55 }
 0x3fc   :  { %v188_v56 = vpop.xlane.xlu0 %187 }
 0x3fd   :  { %vm189_vm7 = vcmp.ge.f32.partialorder %v186_v55, %v188_v56 }
 0x3fe   :  { %v190_v57 = vsel %vm189_vm7, %v485_v34, 128 }
 0x3ff   :  { %v192_v58 = vshra.s32 %v190_v57, 16  ;;  %v191_v60 = vand.u32 65535, %v190_v57 }
 0x401   :  { %v194_v59 = vcvt.s32.f32 %v192_v58  ;;  %v193_v62 = vcvt.s32.f32 %v191_v60 }
 0x403   :  { %195 = vmin.xlane.f32.xlu1 %v194_v59 }
 0x490   :  { %v196_v61 = vpop.xlane.xlu1 %195 }
 0x491   :  { %vm197_vm8 = vcmp.eq.f32.partialorder %v194_v59, %v196_v61  ;;  %v202_v0 = vcvt.f32.s32 %v196_v61 }
 0x492   :  { %v198_v63 = vsel %vm197_vm8, %v193_v62, inf }
 0x493   :  { %199 = vmin.xlane.f32.xlu0 %v198_v63  ;;  %v203_v3 = vshll.u32 %v202_v0, 16 }
 0x520   :  { %v200_v2 = vpop.xlane.xlu0 %199 }
 0x521   :  { %v201_v4 = vcvt.f32.s32 %v200_v2 }
 0x523   :  { %v204_v5 = vadd.s32 %v203_v3, %v201_v4 }
 0x525   :  { %vm205_vm9 = vcmp.eq.s32.totalorder %v485_v34, %v204_v5 }
 0x526   :  { %v263_v6 = vsel %vm205_vm9, 1.0, %v409_v1 }
 0x527   :  { %v208_v7 = vmul.f32 %v263_v6, %v491_v48 }
 0x529   :  { %209 = vadd.xlane.f32.xlu1 %v208_v7 }
 0x5b6   :  { %v210_v8 = vpop.xlane.xlu1 %209 }
 0x5b7   :  { %v343_v9 = vtrunc.f32 %v210_v8 }
 0x5b9   :  { %v344_v11 = vcvt.f32.s32 %v343_v9 }
 0x5bb   :  { %v215_v12 = vsub.s32 0, %v344_v11  ;;  %vm212_vm10 = vcmp.lt.s32.totalorder %v344_v11, 0 }
 0x5bc   :  { %v218_v14 = vsel %vm212_vm10, %v184_v54, %v344_v11  ;;  %vm214_vm13 = vmand %vm212_vm10, %vm213_vm12 }
 0x5bd   :  { %vm219_vm14 = vcmp.eq.s32.totalorder %v476_v27, %v218_v14  ;;  %v216_v15 = vsel %vm214_vm13, %v215_v12, %v183_v13  ;;  %vm217_vm2 = vmor %vm181_vm5, %vm212_vm10 }
 0x5be   :  { %v220_v16 = vsel %vm219_vm14, %v482_v30, -1e+30  ;;  %vm247_vm6 = vmxor %vm217_vm2, %vm410_vm11 }
 0x5bf   :  { %221 = vmax.xlane.f32.xlu0 %v220_v16 }
 0x64c   :  { %v222_v17 = vpop.xlane.xlu0 %221 }
 0x64d   :  { %vm223_vm15 = vcmp.ge.f32.partialorder %v220_v16, %v222_v17 }
 0x64e   :  { %v224_v18 = vsel %vm223_vm15, %v485_v34, 128 }
 0x64f   :  { %v226_v19 = vshra.s32 %v224_v18, 16  ;;  %v225_v21 = vand.u32 65535, %v224_v18 }
 0x651   :  { %v228_v20 = vcvt.s32.f32 %v226_v19  ;;  %v227_v23 = vcvt.s32.f32 %v225_v21 }
 0x653   :  { %229 = vmin.xlane.f32.xlu1 %v228_v20 }
 0x6e0   :  { %v230_v22 = vpop.xlane.xlu1 %229 }
 0x6e1   :  { %vm231_vm0 = vcmp.eq.f32.partialorder %v228_v20, %v230_v22  ;;  %v236_v25 = vcvt.f32.s32 %v230_v22 }
 0x6e2   :  { %v232_v24 = vsel %vm231_vm0, %v227_v23, inf }
 0x6e3   :  { %233 = vmin.xlane.f32.xlu0 %v232_v24  ;;  %v237_v27 = vshll.u32 %v236_v25, 16 }
 0x770   :  { %v234_v26 = vpop.xlane.xlu0 %233 }
 0x771   :  { %v235_v28 = vcvt.f32.s32 %v234_v26 }
 0x773   :  { %v238_v29 = vadd.s32 %v237_v27, %v235_v28 }
 0x775   :  { %vm239_vm1 = vcmp.eq.s32.totalorder %v485_v34, %v238_v29 }
 0x776   :  { %v264_v30 = vsel %vm239_vm1, 1.0, %v409_v1 }
 0x777   :  { %v242_v31 = vmul.f32 %v264_v30, %v491_v48 }
 0x779   :  { %243 = vadd.xlane.f32.xlu1 %v242_v31 }
 0x806   :  { %v244_v32 = vpop.xlane.xlu1 %243 }
 0x807   :  { %v345_v33 = vtrunc.f32 %v244_v32 }
 0x809   :  { %v346_v35 = vcvt.f32.s32 %v345_v33 }
 0x80b   :  { %vm246_vm4 = vcmp.lt.s32.totalorder %v346_v35, 0  ;;  %v249_v36 = vsub.s32 0, %v346_v35 }
 0x80c   :  { %vm248_vm7 = vmand %vm246_vm4, %vm247_vm6 }
 0x80d   :  { %v250_v37 = vsel %vm248_vm7, %v249_v36, %v216_v15 }
 0x80e   :  { %252 = vst.msk [vmem:[%s534_s5] sm:$0xff] %vm251_vm3, %v250_v37 }
 0x80f   :  { %257 = vsyncpa [#allocation3], 1 }
 0x810   :  { %258 = vsyncpa [#allocation5], 1 }

</bundles_post_ra>
